<compile_context>
chip_gen: v5e
topology: v5e:2x2
jax: 0.10.0
libtpu: 0.0.40
codegen_flags: <defaults>
</compile_context>

<pallas_src>
import math

import jax
import jax.numpy as jnp
from jax.experimental import pallas as pl
from jax.experimental.pallas import tpu as pltpu

POWER_INIT = 1.0   # power_initial_value = 1 in QuasiPolySynapse.__init__
LANES = 128        # TPU lane width
SUBLANES = 8       # f32 sublane tiling


def _pow_static(x, p):
    """x ** p for a *static* Python exponent p."""
    p = float(p)
    if p == int(p) and int(p) >= 0:
        n = int(p)
        if n == 0:
            return jnp.ones_like(x)
        y = x                      # n == 1 -> return x directly
        for _ in range(n - 1):
            y = y * x
        return y
    # TODO(synk): negative integer-valued exponents go through jnp.power, which
    # is NaN for negative bases (torch.pow handles them); only matters if a
    # negative power is ever configured.
    return jnp.power(x, p)


def _n_extra_terms(power, n_terms):
    """Iterations of QuasiPolySynapse's extra-term loop."""
    return max(0, min(int(math.floor(float(power)) - 1), n_terms) - 1)


def _quasi_poly(x, power, tw_ref, row, n_terms):
    """Mirrors QuasiPolySynapse.forward; `power` is static (torch drives the
    loop via .item()). term_weights read as scalars from flat SMEM."""
    y = tw_ref[row * n_terms + 0] * _pow_static(x, power)
    for i in range(1, min(int(math.floor(float(power)) - 1), n_terms)):
        y = y + tw_ref[row * n_terms + i] * _pow_static(x, float(i))
    return y


def _make_network4_kernel(powers, n_terms):
    p_a1, p_a2, p_m1, p_m2 = (float(p) for p in powers)

    def kernel(tw_ref, bias_ref, xs_ref, y_ref):
        # tw_ref: (4*n_terms,) SMEM; bias_ref: (1,) SMEM
        # xs_ref: (2, blk, 128) VMEM tile [x0 slab; x1 slab]; y_ref: (blk, 128)
        x0 = xs_ref[0].astype(jnp.float32)
        x1 = xs_ref[1].astype(jnp.float32)

        s1 = _quasi_poly(x0, p_a1, tw_ref, 0, n_terms)   # add_synapse1(x[:, 0])
        s2 = _quasi_poly(x1, p_a2, tw_ref, 1, n_terms)   # add_synapse2(x[:, 1])

        if _n_extra_terms(p_m1, n_terms) == 0 and _n_extra_terms(p_m2, n_terms) == 0:
            # Both product synapses single-term (default power=1 path): fold the
            # two leading weights into one SMEM scalar multiply.
            cw = tw_ref[2 * n_terms + 0] * tw_ref[3 * n_terms + 0]
            prod_term = cw * (_pow_static(x0, p_m1) * _pow_static(x1, p_m2))
        else:
            prod_term = (_quasi_poly(x0, p_m1, tw_ref, 2, n_terms)
                         * _quasi_poly(x1, p_m2, tw_ref, 3, n_terms))

        z = s1 + s2 + prod_term + bias_ref[0]
        # sigmoid(z) == 0.5 * tanh(0.5 * z) + 0.5  -> single EUP transcendental
        y_ref[...] = (0.5 * jnp.tanh(0.5 * z) + 0.5).astype(y_ref.dtype)

    return kernel


def network4_forward_fm(xs, term_weights, bias3,
                        powers=(POWER_INIT,) * 4,
                        block_rows=2048,
                        out_dtype=jnp.float32,
                        vmem_limit_bytes=None):
    """Primary (fast) entry point.

    xs: (2, N) feature-major input, rows [x[:,0], x[:,1]].  When N % 128 == 0
        it is consumed zero-copy (reshape only); otherwise one pad pass is
        added.  Returns the padded lane-dense (rows, 128) slab where
        rows = ceil(N/128); flatten/slice to N only if downstream needs it
        (see network4_forward - that's an extra HBM pass).
    term_weights: (4, n_terms) f32 [add1, add2, prod1, prod2]; bias3: (1,).
    """
    assert xs.ndim == 2 and xs.shape[0] == 2
    n = xs.shape[1]
    n_terms = term_weights.shape[1]

    n_pad = pl.cdiv(n, LANES) * LANES
    if n_pad != n:
        xs = jnp.pad(xs, ((0, 0), (0, n_pad - n)))   # extra pass only when N % 128 != 0
    rows = n_pad // LANES
    xs = xs.reshape(2, rows, LANES)                   # free (row-major) reshape

    # Tile size: as large as sensible (per-step overhead amortization), but
    # keep >= 2 grid steps when possible so the "parallel" grid axis can shard
    # across v7x's two TensorCores. blk=2048 -> 6 MiB double-buffered VMEM:
    # under v5e's 16 MiB scoped default; raise block_rows (and
    # vmem_limit_bytes) to 4096 on v7x for full HBM roofline.
    blk = max(SUBLANES, (int(block_rows) // SUBLANES) * SUBLANES)
    if rows >= 2 * SUBLANES:
        blk = min(blk, max(SUBLANES, ((rows // 2) // SUBLANES) * SUBLANES))
    if blk >= rows:
        blk = rows      # single full-extent block (always layout-legal)
    grid = (pl.cdiv(rows, blk),)   # partial final block handled by the pipeline

    tw_flat = term_weights.astype(jnp.float32).reshape(-1)  # 1-D SMEM (no pad blow-up)
    bias3 = bias3.astype(jnp.float32).reshape(1)

    return pl.pallas_call(
        _make_network4_kernel(powers, n_terms),
        out_shape=jax.ShapeDtypeStruct((rows, LANES), out_dtype),
        grid_spec=pltpu.PrefetchScalarGridSpec(
            num_scalar_prefetch=0,
            grid=grid,
            in_specs=[
                pl.BlockSpec(memory_space=pltpu.MemorySpace.SMEM),   # term_weights (flat)
                pl.BlockSpec(memory_space=pltpu.MemorySpace.SMEM),   # bias3
                pl.BlockSpec((2, blk, LANES), lambda i: (0, i, 0)),  # x0/x1 slabs, 1 DMA/step
            ],
            out_specs=pl.BlockSpec((blk, LANES), lambda i: (i, 0)),
        ),
        compiler_params=pltpu.CompilerParams(
            dimension_semantics=("parallel",),   # shards batch across v7x's 2 TCs
            vmem_limit_bytes=vmem_limit_bytes,
        ),
    )(tw_flat, bias3, xs)


def network4_forward(x, term_weights, bias3, **kwargs):
    """Module-compatible entry point: x (N, 2) -> (N, 1) like Network4.forward.

    NOTE: the (N,2)->(2,N) transpose and the final slice/reshape are extra HBM
    passes outside the kernel; prefer network4_forward_fm with feature-major
    input / slab output when the caller allows it.
    """
    n = x.shape[0]
    y = network4_forward_fm(x.T, term_weights, bias3, **kwargs)
    return y.reshape(-1)[:n].reshape(n, 1)


def _reference_forward(x0, x1, term_weights, bias3):
    # Pure-JAX mirror of Network4.forward (power = 1 -> each synapse is w0 * x).
    s1 = term_weights[0, 0] * x0
    s2 = term_weights[1, 0] * x1
    p1 = term_weights[2, 0] * x0
    p2 = term_weights[3, 0] * x1
    return jax.nn.sigmoid(s1 + s2 + p1 * p2 + bias3[0])


if __name__ == "__main__":
    key = jax.random.PRNGKey(0)
    (k_tw1, k_tw2, k_tw3, k_tw4, k_b1, k_b2, k_b3,
     k_x1, k_x2, k_x3, k_x4) = jax.random.split(key, 11)

    # Deterministic parameter init (shapes from the module's __init__).
    term_weights = jnp.stack([
        jax.random.normal(k_tw1, (3,)),   # add_synapse1.term_weights
        jax.random.normal(k_tw2, (3,)),   # add_synapse2.term_weights
        jax.random.normal(k_tw3, (3,)),   # product_synapse1.term_weights
        jax.random.normal(k_tw4, (3,)),   # product_synapse2.term_weights
    ]).astype(jnp.float32)
    bias1 = jax.random.normal(k_b1, (1,)).astype(jnp.float32)  # unused in forward
    bias2 = jax.random.normal(k_b2, (1,)).astype(jnp.float32)  # unused in forward
    bias3 = jax.random.normal(k_b3, (1,)).astype(jnp.float32)

    # 1) Fast path: feature-major (2, N), N multiple of 128 -> zero-copy slab.
    xs = jax.random.normal(k_x1, (2, 1024), dtype=jnp.float32)
    y_slab = network4_forward_fm(xs, term_weights, bias3)
    jax.block_until_ready(y_slab)
    y_ref = _reference_forward(xs[0], xs[1], term_weights, bias3)
    assert y_slab.shape == (1024 // LANES, LANES)
    assert jnp.allclose(y_slab.reshape(-1), y_ref, atol=1e-5, rtol=1e-5)

    # 2) Module-compatible path: tiny (N, 2) batch -> (N, 1).
    x_small = jax.random.normal(k_x2, (8, 2), dtype=jnp.float32)
    y_small = network4_forward(x_small, term_weights, bias3)
    jax.block_until_ready(y_small)
    y_ref_small = _reference_forward(x_small[:, 0], x_small[:, 1],
                                     term_weights, bias3).reshape(-1, 1)
    assert y_small.shape == (8, 1)
    assert jnp.allclose(y_small, y_ref_small, atol=1e-5, rtol=1e-5)

    # 3) Non-multiple-of-128 batch: pad path + multi-step grid.
    x_mid = jax.random.normal(k_x3, (3000, 2), dtype=jnp.float32)
    y_mid = network4_forward(x_mid, term_weights, bias3, block_rows=16)
    jax.block_until_ready(y_mid)
    y_ref_mid = _reference_forward(x_mid[:, 0], x_mid[:, 1],
                                   term_weights, bias3).reshape(-1, 1)
    assert y_mid.shape == (3000, 1)
    assert jnp.allclose(y_mid, y_ref_mid, atol=1e-5, rtol=1e-5)

    # 4) Partial final block: rows=40, blk=16 -> grid=3 with a ragged tail.
    xs_part = jax.random.normal(k_x4, (2, 40 * LANES), dtype=jnp.float32)
    y_part = network4_forward_fm(xs_part, term_weights, bias3, block_rows=16)
    jax.block_until_ready(y_part)
    y_ref_part = _reference_forward(xs_part[0], xs_part[1], term_weights, bias3)
    assert y_part.shape == (40, LANES)
    assert jnp.allclose(y_part.reshape(-1), y_ref_part, atol=1e-5, rtol=1e-5)

    print("KERNEL_OK")
</pallas_src>

<mosaic_0001>
module attributes {stable_mosaic.version = 11 : i64} {
  func.func @kernel(%arg0: i32, %arg1: memref<12xf32, #tpu.memory_space<smem>>, %arg2: memref<1xf32, #tpu.memory_space<smem>>, %arg3: memref<2x8x128xf32, #tpu.memory_space<vmem>>, %arg4: memref<8x128xf32, #tpu.memory_space<vmem>>) attributes {dimension_semantics = [#tpu.dimension_semantics<parallel>], iteration_bounds = array<i64: 1>, scalar_prefetch = 0 : i64, scratch_operands = 0 : i64, tpu.core_type = #tpu.core_type<tc>, window_params = [{transform_indices = @transform_0, window_bounds = array<i64: 12>}, {transform_indices = @transform_1, window_bounds = array<i64: 1>}, {transform_indices = @transform_2, window_bounds = array<i64: 2, 8, 128>}, {transform_indices = @transform_3, window_bounds = array<i64: 8, 128>}]} {
    %c0 = arith.constant 0 : index
    %c0_0 = arith.constant 0 : index
    %c0_1 = arith.constant 0 : index
    %0 = vector.load %arg3[%c0, %c0_0, %c0_1] : memref<2x8x128xf32, #tpu.memory_space<vmem>>, vector<1x8x128xf32>
    %1 = vector.shape_cast %0 : vector<1x8x128xf32> to vector<8x128xf32>
    %c1 = arith.constant 1 : index
    %c0_2 = arith.constant 0 : index
    %c0_3 = arith.constant 0 : index
    %2 = vector.load %arg3[%c1, %c0_2, %c0_3] : memref<2x8x128xf32, #tpu.memory_space<vmem>>, vector<1x8x128xf32>
    %3 = vector.shape_cast %2 : vector<1x8x128xf32> to vector<8x128xf32>
    %c0_4 = arith.constant 0 : index
    %4 = memref.load %arg1[%c0_4] : memref<12xf32, #tpu.memory_space<smem>>
    %5 = vector.broadcast %4 : f32 to vector<8x128xf32>
    %6 = arith.mulf %5, %1 : vector<8x128xf32>
    %c3 = arith.constant 3 : index
    %7 = memref.load %arg1[%c3] : memref<12xf32, #tpu.memory_space<smem>>
    %8 = vector.broadcast %7 : f32 to vector<8x128xf32>
    %9 = arith.mulf %8, %3 : vector<8x128xf32>
    %c6 = arith.constant 6 : index
    %10 = memref.load %arg1[%c6] : memref<12xf32, #tpu.memory_space<smem>>
    %c9 = arith.constant 9 : index
    %11 = memref.load %arg1[%c9] : memref<12xf32, #tpu.memory_space<smem>>
    %12 = arith.mulf %10, %11 : f32
    %13 = arith.mulf %1, %3 : vector<8x128xf32>
    %14 = vector.broadcast %12 : f32 to vector<8x128xf32>
    %15 = arith.mulf %14, %13 : vector<8x128xf32>
    %16 = arith.addf %6, %9 : vector<8x128xf32>
    %17 = arith.addf %16, %15 : vector<8x128xf32>
    %c0_5 = arith.constant 0 : index
    %18 = memref.load %arg2[%c0_5] : memref<1xf32, #tpu.memory_space<smem>>
    %19 = vector.broadcast %18 : f32 to vector<8x128xf32>
    %20 = arith.addf %17, %19 : vector<8x128xf32>
    %cst = arith.constant 5.000000e-01 : f32
    %21 = vector.broadcast %cst : f32 to vector<8x128xf32>
    %22 = arith.mulf %21, %20 : vector<8x128xf32>
    %23 = math.tanh %22 : vector<8x128xf32>
    %cst_6 = arith.constant 5.000000e-01 : f32
    %24 = vector.broadcast %cst_6 : f32 to vector<8x128xf32>
    %25 = arith.mulf %24, %23 : vector<8x128xf32>
    %cst_7 = arith.constant 5.000000e-01 : f32
    %26 = vector.broadcast %cst_7 : f32 to vector<8x128xf32>
    %27 = arith.addf %25, %26 : vector<8x128xf32>
    %c0_8 = arith.constant 0 : index
    %c0_9 = arith.constant 0 : index
    %28 = vector.load %arg4[%c0_8, %c0_9] : memref<8x128xf32, #tpu.memory_space<vmem>>, vector<8x128xf32>
    tpu.vector_store %arg4[%c0_8, %c0_9], %27 {strides = array<i32>} : memref<8x128xf32, #tpu.memory_space<vmem>>, vector<8x128xf32>,
    return
  }
  func.func @transform_0(%arg0: i32) -> i32 {
    %c0_i32 = arith.constant 0 : i32
    %c0_i32_0 = arith.constant 0 : i32
    return %c0_i32 : i32
  }
  func.func @transform_1(%arg0: i32) -> i32 {
    %c0_i32 = arith.constant 0 : i32
    %c0_i32_0 = arith.constant 0 : i32
    return %c0_i32 : i32
  }
  func.func @transform_2(%arg0: i32) -> (i32, i32, i32) {
    %c0_i32 = arith.constant 0 : i32
    %c0_i32_0 = arith.constant 0 : i32
    %c0_i32_1 = arith.constant 0 : i32
    return %c0_i32, %arg0, %c0_i32_0 : i32, i32, i32
  }
  func.func @transform_3(%arg0: i32) -> (i32, i32) {
    %c0_i32 = arith.constant 0 : i32
    %c0_i32_0 = arith.constant 0 : i32
    return %arg0, %c0_i32 : i32, i32
  }
}

</mosaic_0001>

<bundles_post_ra>
// kernel: tpu_custom_call.1
= control target key start
LH: loop header
LB: loop body
LE: loop exit
PB: predicated region body
PF: predicated region fallthrough
CT: control target
= control target key end

     0   :  { %9 = vsyncpa [#allocation6], 0  ;;  %s201_s0 = inlined_call_operand.vmem [shape: f32[12], index: 0, kind: input, shape index: {}]   ;;  %s202_s1 = inlined_call_operand.<no memory space> [shape: f32[1], index: 1, kind: input, shape index: {}]   ;;  %s203_s2 = inlined_call_operand.hbm [shape: f32[2,8,128], index: 2, kind: input, shape index: {}]   ;;  %s204_s3 = inlined_call_operand.hbm [shape: f32[8,128], index: 3, kind: output, shape index: {}]  }
   0x1   :  { %10 = vsyncpa [#allocation4], 0 }
   0x2   :  { %11 = vsyncpa [#allocation5], 0  ;;  %s17_s14 = sshll.u32 %s201_s0, 4  ;;  %s27_s17 = sshll.u32 %s203_s2, 4  ;;  %s18_s14 = int_to_ptr.vmem [resolvable:$true] %s17_s14  ;;  %s28_s17 = int_to_ptr.hbm [resolvable:$true] %s27_s17 }
   0x3   :  { %s164_s18 = smov [#allocation3]   ;;  %s165_s19 = smov [#allocation7]  }
   0x4   :  { %20 = dma.vmem_to_smem %s18_s14, 16, %s164_s18, [#allocation6]  }
   0x5   :  { %s29_s20 = sshll.u32 %s165_s19, 4  ;;  %s166_s21 = smov 128   ;;  %s30_s20 = int_to_ptr.vmem [resolvable:$true] %s29_s20 }
   0x6   :  { %s167_s22 = smov 8  }
   0x7   :  { %35 = dma.hbm_to_vmem [thread:$0]  %s28_s17, 256, %s30_s20, [#allocation4], %s166_s21, %s166_s21, %s167_s22  }
   0x8   :  { %158 = dma.done.wait [#allocation6], 16  }
   0x9   :  { %159 = vsyncadd [#allocation6], 4294967280 }
   0xa   :  { %160 = dma.done.wait [#allocation4], 256  }
   0xb   :  { %161 = vsyncadd [#allocation4], 4294967040 }
   0xc   :  { %44 = sfence }
   0xd   :  { %s48_s0 = sld [smem:[#allocation3]]  ;;  %v45_v0 = vld [vmem:[#allocation7] sm:$0xff]  ;;  %v47_v1 = vld [vmem:[#allocation7 + $0x8] sm:$0xff]  ;;  %v63_v10 = vstv %s202_s1  ;;  %s168_s28 = smov [#allocation8]  }
   0xe   :  { %s88_s23 = sld [smem:[#allocation3 + $0x3]]  ;;  %v57_v6 = vmul.f32 %v47_v1, %v45_v0  ;;  %s75_s29 = sshll.u32 %s168_s28, 4  ;;  %s76_s29 = int_to_ptr.vmem [resolvable:$true] %s75_s29 }
   0xf   :  { %s89_s24 = sld [smem:[#allocation3 + $0x6]]  ;;  %s77_s5 = sshll.u32 %s204_s3, 4  ;;  %s78_s5 = int_to_ptr.hbm [resolvable:$true] %s77_s5 }
  0x10   :  { %s90_s25 = sld [smem:[#allocation3 + $0x9]] }
  0x13   :  { %v49_v2 = vstv %s48_s0 }
  0x14   :  { %v50_v3 = vmul.f32 %v49_v2, %v45_v0  ;;  %v52_v4 = vstv %s88_s23 }
  0x15   :  { %v53_v5 = vmul.f32 %v52_v4, %v47_v1 }
  0x16   :  { %s56_s2 = smul.f32 %s90_s25, %s89_s24 }
  0x17   :  { %v60_v7 = vadd.f32 %v53_v5, %v50_v3 }
  0x18   :  { %v58_v8 = vstv %s56_s2 }
  0x19   :  { %v59_v9 = vmul.f32 %v58_v8, %v57_v6 }
  0x1b   :  { %v61_v11 = vadd.f32 %v60_v7, %v59_v9 }
  0x1d   :  { %v64_v12 = vadd.f32 %v63_v10, %v61_v11 }
  0x1f   :  { %v65_v13 = vmul.f32 0.5, %v64_v12 }
  0x21   :  { %96 = vtanh.f32 %v65_v13 }
  0x27   :  { %v97_v14 = vpop.eup %96 }
  0x28   :  { %v67_v15 = vmul.f32 0.5, %v97_v14 }
  0x2a   :  { %v68_v16 = vadd.f32 0.5, %v67_v15 }
  0x2c   :  { %69 = vst [vmem:[#allocation8] sm:$0xff] %v68_v16 }
  0x2d   :  { %80 = dma.vmem_to_hbm [thread:$0]  %s76_s29, 128, %s78_s5, [#allocation5]  }
  0x2e   :  { %162 = dma.done.wait [#allocation5], 128  }
  0x2f   :  { %163 = vsyncadd [#allocation5], 4294967168 }
  0x30   :  { %85 = vsyncpa [#allocation4], 1 }
  0x31   :  { %86 = vsyncpa [#allocation5], 1 }
  0x32   :  { %87 = vsyncpa [#allocation6], 1 }

</bundles_post_ra>
